<compile_context>
chip_gen: v7x
topology: tpu7x:2x2x1
jax: 0.10.0
libtpu: 0.0.40
codegen_flags: <defaults>
</compile_context>

<pallas_src>
import functools

import jax
import jax.numpy as jnp
from jax.experimental import pallas as pl
from jax.experimental.pallas import tpu as pltpu

HIDDEN = 128
SUBLANE = 8     # f32 sublane count


def _round_up(n, m):
    return ((n + m - 1) // m) * m


def _policy_kernel(x_ref, w1_ref, b1_ref, w2_ref, b2_ref, out_ref, *, matmul_dtype):
    # x:  [tB, S] f32          w1: [S, H] matmul_dtype   b1: [1, H] f32
    # w2: [H, A] matmul_dtype  b2: [1, A] f32            out: [tB, A] f32
    x = x_ref[...].astype(matmul_dtype)

    # dense1 + ReLU (MXU accumulates in f32; bias/ReLU in f32).
    h = jnp.dot(x, w1_ref[...], preferred_element_type=jnp.float32) + b1_ref[...]
    h = jnp.maximum(h, 0.0)

    # dense2. NOTE: h is intentionally re-cast to matmul_dtype (bf16 by default),
    # so logits carry bf16 rounding; acceptable for a softmax policy head.
    logits = (jnp.dot(h.astype(matmul_dtype), w2_ref[...],
                      preferred_element_type=jnp.float32) + b2_ref[...])

    # Numerically-stable softmax with an exact divide -> each row sums to 1
    # to f32 accuracy (the approximate reciprocal previously did not).
    m = jnp.max(logits, axis=-1, keepdims=True)
    e = jnp.exp(logits - m)
    denom = jnp.sum(e, axis=-1, keepdims=True)
    out_ref[...] = (e / denom).astype(out_ref.dtype)


def policy_net_forward(x, w1, b1, w2, b2, *, block_b=4096, matmul_dtype=jnp.bfloat16):
    """Fused forward pass of PolicyNet.

    x:  [B, state_dim] float32
    w1: [state_dim, 128], b1: [1, 128] (or [128])
    w2: [128, action_dim], b2: [1, action_dim] (or [action_dim])
    returns: [B, action_dim] float32 softmax distribution
    """
    B, state_dim = x.shape
    hidden = w1.shape[1]
    action_dim = w2.shape[1]

    b1 = b1.reshape(1, hidden).astype(jnp.float32)
    b2 = b2.reshape(1, action_dim).astype(jnp.float32)
    # Weights are DMA'd once per call (constant index_maps); casting them in the
    # wrapper is free and halves their HBM/VMEM footprint vs. per-step casts.
    w1 = w1.astype(matmul_dtype)
    w2 = w2.astype(matmul_dtype)
    x = x.astype(jnp.float32)

    # Balanced batch tiling: 8-aligned tiles, at least 4 grid steps when the
    # batch allows it (>= 2 steps per megacore shard on v7x), waste < 8 rows/tile.
    min_tiles = 4 if B >= 4 * SUBLANE else 1
    n_tiles = max(pl.cdiv(B, block_b), min_tiles)
    tile_b = _round_up(pl.cdiv(B, n_tiles), SUBLANE)
    grid_len = pl.cdiv(B, tile_b)
    b_pad = grid_len * tile_b
    if b_pad != B:
        x = jnp.pad(x, ((0, b_pad - B), (0, 0)))

    kernel = functools.partial(_policy_kernel, matmul_dtype=matmul_dtype)

    out = pl.pallas_call(
        kernel,
        out_shape=jax.ShapeDtypeStruct((b_pad, action_dim), jnp.float32),
        grid_spec=pltpu.PrefetchScalarGridSpec(
            num_scalar_prefetch=0,
            grid=(grid_len,),
            in_specs=[
                pl.BlockSpec((tile_b, state_dim), lambda i: (i, 0)),   # x: batch-tiled
                pl.BlockSpec((state_dim, hidden), lambda i: (0, 0)),   # w1: resident
                pl.BlockSpec((1, hidden), lambda i: (0, 0)),           # b1: resident
                pl.BlockSpec((hidden, action_dim), lambda i: (0, 0)),  # w2: resident
                pl.BlockSpec((1, action_dim), lambda i: (0, 0)),       # b2: resident
            ],
            # Only the real action columns are written back (no padded slab).
            out_specs=pl.BlockSpec((tile_b, action_dim), lambda i: (i, 0)),
        ),
        compiler_params=pltpu.CompilerParams(
            dimension_semantics=("parallel",),     # megacore sharding on v7x
            vmem_limit_bytes=32 * 1024 * 1024,     # headroom for tile_b up to ~4096
        ),
    )(x, w1, b1, w2, b2)

    return out[:B] if b_pad != B else out


def init_params(key, state_dim, action_dim):
    """Deterministic init mimicking nn.Linear default (U(-1/sqrt(fan_in), +))."""
    k1, k2, k3, k4 = jax.random.split(key, 4)
    bound1 = 1.0 / jnp.sqrt(jnp.float32(state_dim))
    bound2 = 1.0 / jnp.sqrt(jnp.float32(HIDDEN))
    w1 = jax.random.uniform(k1, (state_dim, HIDDEN), jnp.float32, -bound1, bound1)
    b1 = jax.random.uniform(k2, (1, HIDDEN), jnp.float32, -bound1, bound1)
    w2 = jax.random.uniform(k3, (HIDDEN, action_dim), jnp.float32, -bound2, bound2)
    b2 = jax.random.uniform(k4, (1, action_dim), jnp.float32, -bound2, bound2)
    return w1, b1, w2, b2


if __name__ == "__main__":
    key = jax.random.PRNGKey(0)
    k_x, k_p, k_big = jax.random.split(key, 3)

    batch, state_dim, action_dim = 2, 16, 8
    x = jax.random.normal(k_x, (batch, state_dim), jnp.float32)
    w1, b1, w2, b2 = init_params(k_p, state_dim, action_dim)

    def ref_forward(xin):
        h = jnp.maximum(xin @ w1 + b1, 0.0)
        return jax.nn.softmax(h @ w2 + b2, axis=-1)

    # Small problem, f32 MXU operands -> tight tolerance. Exact softmax divide.
    dist = policy_net_forward(x, w1, b1, w2, b2, matmul_dtype=jnp.float32)
    dist = jax.block_until_ready(dist)
    ref = ref_forward(x)
    assert dist.shape == (batch, action_dim)
    assert jnp.allclose(dist, ref, atol=1e-4, rtol=1e-4)
    assert jnp.allclose(jnp.sum(dist, axis=-1), 1.0, atol=1e-4)

    # Larger batch: 4 grid steps, bf16 MXU operands (the default fast path).
    big_b = 1024
    x_big = jax.random.normal(k_big, (big_b, state_dim), jnp.float32)
    dist_big = policy_net_forward(x_big, w1, b1, w2, b2)
    dist_big = jax.block_until_ready(dist_big)
    ref_big = ref_forward(x_big)
    assert dist_big.shape == (big_b, action_dim)
    assert jnp.allclose(dist_big, ref_big, atol=3e-2, rtol=3e-2)
    assert jnp.allclose(jnp.sum(dist_big, axis=-1), 1.0, atol=1e-4)

    print("KERNEL_OK")
</pallas_src>

<mosaic_0001>
module attributes {stable_mosaic.version = 11 : i64} {
  func.func @_policy_kernel(%arg0: i32, %arg1: memref<8x16xf32, #tpu.memory_space<vmem>>, %arg2: memref<16x128xf32, #tpu.memory_space<vmem>>, %arg3: memref<1x128xf32, #tpu.memory_space<vmem>>, %arg4: memref<128x8xf32, #tpu.memory_space<vmem>>, %arg5: memref<1x8xf32, #tpu.memory_space<vmem>>, %arg6: memref<8x8xf32, #tpu.memory_space<vmem>>) attributes {dimension_semantics = [#tpu.dimension_semantics<parallel>], iteration_bounds = array<i64: 1>, scalar_prefetch = 0 : i64, scratch_operands = 0 : i64, tpu.core_type = #tpu.core_type<tc>, window_params = [{transform_indices = @transform_0, window_bounds = array<i64: 8, 16>}, {pipeline_mode = #tpu.pipeline_mode<synchronous>, transform_indices = @transform_1, window_bounds = array<i64: 16, 128>}, {pipeline_mode = #tpu.pipeline_mode<synchronous>, transform_indices = @transform_2, window_bounds = array<i64: 1, 128>}, {pipeline_mode = #tpu.pipeline_mode<synchronous>, transform_indices = @transform_3, window_bounds = array<i64: 128, 8>}, {pipeline_mode = #tpu.pipeline_mode<synchronous>, transform_indices = @transform_4, window_bounds = array<i64: 1, 8>}, {transform_indices = @transform_5, window_bounds = array<i64: 8, 8>}]} {
    %c0 = arith.constant 0 : index
    %c0_0 = arith.constant 0 : index
    %0 = vector.load %arg1[%c0, %c0_0] : memref<8x16xf32, #tpu.memory_space<vmem>>, vector<8x16xf32>
    %c0_1 = arith.constant 0 : index
    %c0_2 = arith.constant 0 : index
    %1 = vector.load %arg2[%c0_1, %c0_2] : memref<16x128xf32, #tpu.memory_space<vmem>>, vector<16x128xf32>
    %cst = arith.constant dense<0.000000e+00> : vector<8x128xf32>
    %2 = tpu.matmul %0, %1, %cst {dimension_numbers = #tpu.dot_dimension_numbers<[1], [0], [0], [1], [0, 0, 1, 1], [], []>} : vector<8x16xf32>, vector<16x128xf32>, vector<8x128xf32> -> vector<8x128xf32>
    %c0_3 = arith.constant 0 : index
    %c0_4 = arith.constant 0 : index
    %3 = vector.load %arg3[%c0_3, %c0_4] : memref<1x128xf32, #tpu.memory_space<vmem>>, vector<1x128xf32>
    %4 = vector.broadcast %3 : vector<1x128xf32> to vector<8x128xf32>
    %5 = arith.addf %2, %4 : vector<8x128xf32>
    %cst_5 = arith.constant 0.000000e+00 : f32
    %6 = vector.broadcast %cst_5 : f32 to vector<8x128xf32>
    %7 = arith.maximumf %5, %6 : vector<8x128xf32>
    %c0_6 = arith.constant 0 : index
    %c0_7 = arith.constant 0 : index
    %8 = vector.load %arg4[%c0_6, %c0_7] : memref<128x8xf32, #tpu.memory_space<vmem>>, vector<128x8xf32>
    %cst_8 = arith.constant dense<0.000000e+00> : vector<8x8xf32>
    %9 = tpu.matmul %7, %8, %cst_8 {dimension_numbers = #tpu.dot_dimension_numbers<[1], [0], [0], [1], [0, 0, 1, 1], [], []>} : vector<8x128xf32>, vector<128x8xf32>, vector<8x8xf32> -> vector<8x8xf32>
    %c0_9 = arith.constant 0 : index
    %c0_10 = arith.constant 0 : index
    %10 = vector.load %arg5[%c0_9, %c0_10] : memref<1x8xf32, #tpu.memory_space<vmem>>, vector<1x8xf32>
    %11 = vector.broadcast %10 : vector<1x8xf32> to vector<8x8xf32>
    %12 = arith.addf %9, %11 : vector<8x8xf32>
    %cst_11 = arith.constant dense<0xFF800000> : vector<8xf32>
    %13 = vector.multi_reduction <maximumf>, %12, %cst_11 [1] : vector<8x8xf32> to vector<8xf32>
    %14 = vector.shape_cast %13 : vector<8xf32> to vector<8x1xf32>
    %15 = vector.broadcast %14 : vector<8x1xf32> to vector<8x8xf32>
    %16 = arith.subf %12, %15 : vector<8x8xf32>
    %17 = math.exp %16 : vector<8x8xf32>
    %cst_12 = arith.constant dense<0.000000e+00> : vector<8xf32>
    %18 = vector.multi_reduction <add>, %17, %cst_12 [1] : vector<8x8xf32> to vector<8xf32>
    %19 = vector.shape_cast %18 : vector<8xf32> to vector<8x1xf32>
    %20 = vector.broadcast %19 : vector<8x1xf32> to vector<8x8xf32>
    %21 = arith.divf %17, %20 : vector<8x8xf32>
    %c0_13 = arith.constant 0 : index
    %c0_14 = arith.constant 0 : index
    %22 = vector.load %arg6[%c0_13, %c0_14] : memref<8x8xf32, #tpu.memory_space<vmem>>, vector<8x8xf32>
    tpu.vector_store %arg6[%c0_13, %c0_14], %21 {strides = array<i32>} : memref<8x8xf32, #tpu.memory_space<vmem>>, vector<8x8xf32>,
    return
  }
  func.func @transform_0(%arg0: i32) -> (i32, i32) {
    %c0_i32 = arith.constant 0 : i32
    %c0_i32_0 = arith.constant 0 : i32
    return %arg0, %c0_i32 : i32, i32
  }
  func.func @transform_1(%arg0: i32) -> (i32, i32) {
    %c0_i32 = arith.constant 0 : i32
    %c0_i32_0 = arith.constant 0 : i32
    %c0_i32_1 = arith.constant 0 : i32
    return %c0_i32, %c0_i32_0 : i32, i32
  }
  func.func @transform_2(%arg0: i32) -> (i32, i32) {
    %c0_i32 = arith.constant 0 : i32
    %c0_i32_0 = arith.constant 0 : i32
    %c0_i32_1 = arith.constant 0 : i32
    return %c0_i32, %c0_i32_0 : i32, i32
  }
  func.func @transform_3(%arg0: i32) -> (i32, i32) {
    %c0_i32 = arith.constant 0 : i32
    %c0_i32_0 = arith.constant 0 : i32
    %c0_i32_1 = arith.constant 0 : i32
    return %c0_i32, %c0_i32_0 : i32, i32
  }
  func.func @transform_4(%arg0: i32) -> (i32, i32) {
    %c0_i32 = arith.constant 0 : i32
    %c0_i32_0 = arith.constant 0 : i32
    %c0_i32_1 = arith.constant 0 : i32
    return %c0_i32, %c0_i32_0 : i32, i32
  }
  func.func @transform_5(%arg0: i32) -> (i32, i32) {
    %c0_i32 = arith.constant 0 : i32
    %c0_i32_0 = arith.constant 0 : i32
    return %arg0, %c0_i32 : i32, i32
  }
}

</mosaic_0001>

<bundles_post_ra>
// kernel: tpu_custom_call.1
= control target key start
LH: loop header
LB: loop body
LE: loop exit
PB: predicated region body
PF: predicated region fallthrough
CT: control target
= control target key end

     0   :  { %v350_v2 = vmov 0.0|0.0   ;;  %vm351_vm0 = vmmov 0   ;;  %v352_v4 = vmov 0.0   ;;  %vm31_vm1 = vcmask 130048   ;;  %s462_s0 = inlined_call_operand.vmem [shape: f32[8,16], index: 0, kind: input, shape index: {}]   ;;  %s463_s1 = inlined_call_operand.vmem [shape: f32[16,128], index: 1, kind: input, shape index: {}]   ;;  %s464_s2 = inlined_call_operand.vmem [shape: f32[1,128], index: 2, kind: input, shape index: {}]   ;;  %s465_s3 = inlined_call_operand.vmem [shape: f32[128,8], index: 3, kind: input, shape index: {}]   ;;  %s466_s4 = inlined_call_operand.vmem [shape: f32[1,8], index: 4, kind: input, shape index: {}]   ;;  %s467_s5 = inlined_call_operand.hbm [shape: f32[8,8], index: 5, kind: output, shape index: {}]  }
   0x1   :  { %v22_v0 = vld [vmem:[%s463_s1] sm:$0xff]  ;;  %v23_v1 = vld [vmem:[%s463_s1 + $0x8] sm:$0xff]  ;;  %291 = vmatprep.subr.bf16.mxu0 %v350_v2  ;;  %253 = vmatprep.mubr.msk.f32.mxu0 %vm351_vm0, %v352_v4  ;;  %v108_v7 = vld [vmem:[%s465_s3 + $0x10] sm:$0xff] }
   0x2   :  { %v292_v3 = vpack.c.bf16 %v23_v1, %v22_v0  ;;  %v106_v5 = vld [vmem:[%s465_s3] sm:$0xff]  ;;  %v107_v6 = vld [vmem:[%s465_s3 + $0x8] sm:$0xff]  ;;  %294 = vmatprep.subr.bf16.mxu1 %v350_v2  ;;  %v109_v9 = vld [vmem:[%s465_s3 + $0x18] sm:$0xff]  ;;  %288 = vmatprep.mubr.msk.f32.mxu1 %vm351_vm0, %v352_v4 }
   0x3   :  { %v295_v8 = vpack.c.bf16 %v107_v6, %v106_v5  ;;  %v21_v10 = vld [vmem:[%s462_s0] sm:$0xff]  ;;  %v298_v11 = vpack.c.bf16 %v109_v9, %v108_v7  ;;  %v111_v13 = vld [vmem:[%s465_s3 + $0x28] sm:$0xff] }
   0x4   :  { %293 = vmatpush3.bf16.msra.mxu0 %v292_v3  ;;  %v110_v12 = vld [vmem:[%s465_s3 + $0x20] sm:$0xff] }
   0x5   :  { %296 = vmatpush3.bf16.msra.mxu1 %v295_v8 }
   0x6   :  { %297 = vmatprep.subr.bf16.mxu1 %v350_v2 }
   0x7   :  { %254 = vmatmul.mubr.msk.f32.vlgmr.msra.gmra.mrb[0].mxu0 %vm31_vm1, %v21_v10 }
   0x8   :  { %10 = vsyncpa [#allocation3], 0  ;;  %v301_v14 = vpack.c.bf16 %v111_v13, %v110_v12  ;;  %v112_v15 = vld [vmem:[%s465_s3 + $0x30] sm:$0xff]  ;;  %v113_v16 = vld [vmem:[%s465_s3 + $0x38] sm:$0xff]  ;;  %vm199_vm2 = vcmask 64512  }
   0x9   :  { %299 = vmatpush3.bf16.msra.mxu1 %v298_v11  ;;  %v304_v17 = vpack.c.bf16 %v113_v16, %v112_v15  ;;  %v114_v18 = vld [vmem:[%s465_s3 + $0x40] sm:$0xff]  ;;  %v115_v19 = vld [vmem:[%s465_s3 + $0x48] sm:$0xff]  ;;  %v116_v21 = vld [vmem:[%s465_s3 + $0x50] sm:$0xff] }
   0xa   :  { %300 = vmatprep.subr.bf16.mxu1 %v350_v2  ;;  %v307_v20 = vpack.c.bf16 %v115_v19, %v114_v18  ;;  %v117_v22 = vld [vmem:[%s465_s3 + $0x58] sm:$0xff]  ;;  %v118_v24 = vld [vmem:[%s465_s3 + $0x60] sm:$0xff]  ;;  %v119_v25 = vld [vmem:[%s465_s3 + $0x68] sm:$0xff] }
   0xb   :  { %v310_v23 = vpack.c.bf16 %v117_v22, %v116_v21  ;;  %v313_v26 = vpack.c.bf16 %v119_v25, %v118_v24  ;;  %v120_v27 = vld [vmem:[%s465_s3 + $0x70] sm:$0xff]  ;;  %v121_v28 = vld [vmem:[%s465_s3 + $0x78] sm:$0xff]  ;;  %v226_v30 = vld [vmem:[%s464_s2] ss:$0 sm:$0xff]  ;;  %s353_s2 = smov [#allocation2]  }
   0xc   :  { %v316_v29 = vpack.c.bf16 %v121_v28, %v120_v27  ;;  %v228_v35 = vld [vmem:[%s466_s4] ss:$0 sm:$0xff]  ;;  %s218_s3 = sshll.u32 %s353_s2, 4  ;;  %s219_s3 = int_to_ptr.vmem [resolvable:$true] %s218_s3 }
   0xd   :  { %302 = vmatpush3.bf16.msra.mxu1 %v301_v14  ;;  %s326_s4 = scalar_lea.vmem %s219_s3, 128  ;;  %p331_p1 = scmp.lt.s32.totalorder %s219_s3, %s219_s3 }
   0xe   :  { %303 = vmatprep.subr.bf16.mxu1 %v350_v2  ;;  %p327_p0 = scmp.ne.s32.totalorder %s219_s3, %s326_s4  ;;  %p332_p2 = scmp.lt.s32.totalorder %s326_s4, %s326_s4 }
  0x10   :  { %p333_p3 = por %p332_p2, %p331_p1 }
  0x11   :  { %305 = vmatpush3.bf16.msra.mxu1 %v304_v17 }
  0x12   :  { %306 = vmatprep.subr.bf16.mxu1 %v350_v2  ;;  %p334_p4 = pnand %p333_p3, %p327_p0 }
  0x15   :  { %308 = vmatpush3.bf16.msra.mxu1 %v307_v20 }
  0x16   :  { %309 = vmatprep.subr.bf16.mxu1 %v350_v2 }
  0x19   :  { %311 = vmatpush3.bf16.msra.mxu1 %v310_v23 }
  0x1a   :  { %312 = vmatprep.subr.bf16.mxu1 %v350_v2 }
  0x1d   :  { %314 = vmatpush3.bf16.msra.mxu1 %v313_v26 }
  0x1e   :  { %315 = vmatprep.subr.bf16.mxu1 %v350_v2 }
  0x21   :  { %317 = vmatpush3.bf16.msra.mxu1 %v316_v29 }
  0xda   :  { %v101_v31 = vpop.f32.mrb[0].mxu0 }
  0xdb   :  { %v102_v32 = vadd.f32 %v226_v30, %v101_v31  ;;  %v255_v33 = vpop.f32.mrb[1].mxu0 }
  0xdd   :  { %v105_v34 = vmax.f32 %v102_v32, 0.0 }
  0xdf   :  { %289 = vmatmul.mubr.f32.vlgmr.msra.gmra.mrb[0].mxu1 %v105_v34 }
 0x1b2   :  { %v195_v36 = vpop.f32.mrb[0].mxu1 }
 0x1b3   :  { %v196_v37 = vadd.f32 %v228_v35, %v195_v36  ;;  %v290_v38 = vpop.f32.mrb[1].mxu1 }
 0x1b5   :  { %v200_v39 = vsel %vm199_vm2, %v196_v37, -inf }
 0x1b6   :  { %201 = vmax.xlane.f32.xlu0 %v200_v39 }
 0x243   :  { %v202_v40 = vpop.xlane.xlu0 %201 }
 0x244   :  { %v203_v41 = vsub.f32 %v196_v37, %v202_v40 }
 0x246   :  { %v204_v42 = vmul.f32 1.442695, %v203_v41 }
 0x248   :  { %322 = vpow2.f32 %v204_v42 }
 0x252   :  { %v323_v43 = vpop.eup %322 }
 0x253   :  { %v206_v44 = vsel %vm199_vm2, %v323_v43, 0.0 }
 0x254   :  { %207 = vadd.xlane.f32.xlu0 %v206_v44 }
 0x2e1   :  { %v208_v45 = vpop.xlane.xlu0 %207 }
 0x2e2   :  { %324 = vrcp.f32 %v208_v45 }
 0x2ec   :  { %v325_v46 = vpop.eup %324 }
 0x2ed   :  { %v210_v47 = vmul.f32 %v325_v46, %v323_v43 }
 0x2ef   :  { %211 = vst.msk [vmem:[#allocation2] sm:$0xff] %vm199_vm2, %v210_v47 }
 0x2f0   :  { %337 = shalt.err (!%p334_p4)
}
 0x2f1   :  { %s338_s9 = scalar_lea.hbm %s467_s5, 128 }
 0x2f2   :  { %p339_p5 = scmp.ne.s32.totalorder %s467_s5, %s338_s9  ;;  %p342_p6 = scmp.lt.u32.totalorder %s338_s9, %s467_s5 }
 0x2f4   :  { %p344_p7 = pnand %p342_p6, %p339_p5 }
 0x2f6   :  { %347 = shalt.err (!%p344_p7)
}
 0x2f7   :  { %221 = dma.vmem_to_hbm [thread:$0]  %s219_s3, 128, %s467_s5, [#allocation3]  }
 0x2f8   :  { %348 = dma.done.wait [#allocation3], 128  }
 0x2f9   :  { %349 = vsyncadd [#allocation3], 4294967168 }
 0x2fa   :  { %225 = vsyncpa [#allocation3], 1 }

</bundles_post_ra>
